<compile_context>
chip_gen: v5e
topology: v5e:2x2
jax: 0.10.0
libtpu: 0.0.40
codegen_flags: <defaults>
</compile_context>

<pallas_src>
import functools

import jax
import jax.numpy as jnp
from jax.experimental import pallas as pl
from jax.experimental.pallas import tpu as pltpu

_SUB = 8      # padded batch rows: one full sublane block
_LANES = 128  # slab lane width: one full lane block


def _tiny_lstm_kernel(slab_ref, out_ref, *, T, H, r_x, r_wih, r_whh, r_b,
                      r_fcw, r_fcb):
    """Whole-problem kernel (no grid); everything resident in VMEM/vregs.

    slab_ref: (ROWS, 128) f32 slab holding, at static row offsets:
        x (time-major, batch padded to 8 rows/step, lanes >= I zero),
        W_ih^T padded to (128, 128) (rows >= I zero, g columns pre-scaled 2x),
        W_hh^T (H, 4H) (g columns pre-scaled 2x),
        bias (1, 4H) (= b_ih + b_hh, g columns pre-scaled 2x),
        FC weight^T (H, 128) (lanes >= O zero), FC bias (1, 128).
    out_ref : (8, 128) lane-dense output tile; rows >= B / lanes >= O padding.
    """
    # Static, sublane-aligned row slices of the single VMEM slab.
    x_tm = slab_ref[r_x:r_x + T * _SUB, :]       # (T*8, 128)
    w_ih = slab_ref[r_wih:r_wih + _LANES, :]     # (128, 128)
    w_hh = slab_ref[r_whh:r_whh + H, :]          # (H, 128)
    bias = slab_ref[r_b:r_b + 1, :]              # (1, 128)
    fc_w = slab_ref[r_fcw:r_fcw + H, :]          # (H, 128)
    fc_b = slab_ref[r_fcb:r_fcb + 1, :]          # (1, 128)

    # ---- Hoisted input projection: one MXU pass covers every timestep. ----
    xp = jnp.dot(x_tm, w_ih, preferred_element_type=jnp.float32) + bias

    h = jnp.zeros((_SUB, H), jnp.float32)
    c = jnp.zeros((_SUB, H), jnp.float32)

    # ---- Fully-unrolled serial recurrence (static trip count T). ----
    for t in range(T):
        # Sublane-aligned static slice of the hoisted projection.
        g_pre = xp[t * _SUB:(t + 1) * _SUB, :] + jnp.dot(
            h, w_hh, preferred_element_type=jnp.float32)       # (8, 128)

        # Single EUP pass over the full 128-lane gate vreg; the g-gate tanh is
        # recovered from it via the (exact) identity tanh(z) = 2*sigmoid(2z)-1
        # because the g columns were pre-scaled by 2 in the wrapper.
        sg = jax.nn.sigmoid(g_pre)
        i_g = sg[:, 0 * H:1 * H]
        f_g = sg[:, 1 * H:2 * H]
        g_g = 2.0 * sg[:, 2 * H:3 * H] - 1.0
        o_g = sg[:, 3 * H:4 * H]

        c = f_g * c + i_g * g_g
        h = o_g * jnp.tanh(c)

    # ---- Final Linear on the last hidden state: fc(out[:, -1, :]). ----
    out = jnp.dot(h, fc_w, preferred_element_type=jnp.float32) + fc_b  # (8,128)
    out_ref[...] = out.astype(out_ref.dtype)


@jax.jit
def tiny_lstm_forward(x, w_ih, w_hh, b_ih, b_hh, fc_w, fc_b):
    """x: (B, T, I) float32 (batch_first, as in the PyTorch module).

    w_ih: (4H, I), w_hh: (4H, H), b_ih/b_hh: (4H,)  -- PyTorch LSTM params
    fc_w: (O, H), fc_b: (O,)                        -- PyTorch Linear params
    Returns (B, O), matching `fc(lstm(x)[0][:, -1, :])`.
    """
    B, T, I = x.shape
    H4 = w_ih.shape[0]
    H = H4 // 4
    O = fc_w.shape[0]
    assert B <= _SUB and I <= _LANES and H4 <= _LANES and O <= _LANES

    f32 = jnp.float32

    # ---- time-major, batch-padded (8 sublanes), lane-padded input ----------
    x_tm = jnp.transpose(x, (1, 0, 2)).astype(f32)                # (T, B, I)
    x_tm = jnp.pad(x_tm, ((0, 0), (0, _SUB - B), (0, _LANES - I)))
    x_tm = x_tm.reshape(T * _SUB, _LANES)

    # ---- g-gate columns (2H:3H) pre-scaled by 2: tanh(z)=2*sigmoid(2z)-1 ---
    gate_scale = jnp.concatenate([
        jnp.ones((2 * H,), f32), jnp.full((H,), 2.0, f32), jnp.ones((H,), f32)])

    w_ih_t = (w_ih.astype(f32) * gate_scale[:, None]).T           # (I, 4H)
    w_hh_t = (w_hh.astype(f32) * gate_scale[:, None]).T           # (H, 4H)
    bias = ((b_ih + b_hh).astype(f32) * gate_scale).reshape(1, H4)

    Hr = ((H + _SUB - 1) // _SUB) * _SUB                          # 8-row align
    w_ih_pad = jnp.zeros((_LANES, _LANES), f32).at[:I, :H4].set(w_ih_t)
    w_hh_pad = jnp.zeros((Hr, _LANES), f32).at[:H, :H4].set(w_hh_t)
    b_pad = jnp.zeros((_SUB, _LANES), f32).at[:1, :H4].set(bias)
    fcw_pad = jnp.zeros((Hr, _LANES), f32).at[:H, :O].set(fc_w.astype(f32).T)
    fcb_pad = jnp.zeros((_SUB, _LANES), f32).at[:1, :O].set(
        fc_b.astype(f32).reshape(1, O))

    # ---- single slab => one HBM->VMEM DMA instead of seven -----------------
    r_x = 0
    r_wih = r_x + T * _SUB
    r_whh = r_wih + _LANES
    r_b = r_whh + Hr
    r_fcw = r_b + _SUB
    r_fcb = r_fcw + Hr
    slab = jnp.concatenate(
        [x_tm, w_ih_pad, w_hh_pad, b_pad, fcw_pad, fcb_pad], axis=0)

    kernel = functools.partial(
        _tiny_lstm_kernel, T=T, H=H, r_x=r_x, r_wih=r_wih, r_whh=r_whh,
        r_b=r_b, r_fcw=r_fcw, r_fcb=r_fcb)

    vmem = pltpu.MemorySpace.VMEM
    out_pad = pl.pallas_call(
        kernel,
        out_shape=jax.ShapeDtypeStruct((_SUB, _LANES), f32),
        in_specs=[pl.BlockSpec(memory_space=vmem)],   # whole slab, VMEM
        out_specs=pl.BlockSpec(memory_space=vmem),    # lane-dense (8,128) tile
    )(slab)
    return out_pad[:B, :O]


def _reference_forward(x, w_ih, w_hh, b_ih, b_hh, fc_w, fc_b):
    """Pure-JAX reference replicating PyTorch nn.LSTM + Linear semantics."""
    B, T, I = x.shape
    H = w_hh.shape[1]

    def step(carry, x_t):
        h, c = carry
        gates = x_t @ w_ih.T + b_ih + h @ w_hh.T + b_hh
        i = jax.nn.sigmoid(gates[:, 0 * H:1 * H])
        f = jax.nn.sigmoid(gates[:, 1 * H:2 * H])
        g = jnp.tanh(gates[:, 2 * H:3 * H])
        o = jax.nn.sigmoid(gates[:, 3 * H:4 * H])
        c = f * c + i * g
        h = o * jnp.tanh(c)
        return (h, c), h

    init = (jnp.zeros((B, H), jnp.float32), jnp.zeros((B, H), jnp.float32))
    (h_last, _), _ = jax.lax.scan(step, init, jnp.transpose(x, (1, 0, 2)))
    return h_last @ fc_w.T + fc_b


if __name__ == "__main__":
    # Small shapes consistent with the module: batch=2, seq=8, input=4,
    # hidden=32, output=8.
    B, T, I, H, O = 2, 8, 4, 32, 8

    key = jax.random.PRNGKey(0)
    keys = jax.random.split(key, 8)
    bound = 1.0 / jnp.sqrt(H)

    x = jax.random.normal(keys[0], (B, T, I), dtype=jnp.float32)
    # PyTorch-style uniform(-1/sqrt(H), 1/sqrt(H)) init.
    w_ih = jax.random.uniform(keys[1], (4 * H, I), jnp.float32, -bound, bound)
    w_hh = jax.random.uniform(keys[2], (4 * H, H), jnp.float32, -bound, bound)
    b_ih = jax.random.uniform(keys[3], (4 * H,), jnp.float32, -bound, bound)
    b_hh = jax.random.uniform(keys[4], (4 * H,), jnp.float32, -bound, bound)
    fc_w = jax.random.uniform(keys[5], (O, H), jnp.float32, -bound, bound)
    fc_b = jax.random.uniform(keys[6], (O,), jnp.float32, -bound, bound)

    out = tiny_lstm_forward(x, w_ih, w_hh, b_ih, b_hh, fc_w, fc_b)
    out = jax.block_until_ready(out)

    ref = _reference_forward(x, w_ih, w_hh, b_ih, b_hh, fc_w, fc_b)
    assert out.shape == (B, O)
    assert jnp.allclose(out, ref, atol=2e-5, rtol=2e-5), (out, ref)

    print("KERNEL_OK")
</pallas_src>

<mosaic_0001>
module attributes {stable_mosaic.version = 11 : i64} {
  func.func @_tiny_lstm_kernel(%arg0: memref<272x128xf32, #tpu.memory_space<vmem>>, %arg1: memref<8x128xf32, #tpu.memory_space<vmem>>) attributes {dimension_semantics = [], scalar_prefetch = 0 : i64, scratch_operands = 0 : i64, tpu.core_type = #tpu.core_type<tc>} {
    %c0 = arith.constant 0 : index
    %c0_0 = arith.constant 0 : index
    %0 = vector.load %arg0[%c0, %c0_0] : memref<272x128xf32, #tpu.memory_space<vmem>>, vector<64x128xf32>
    %c64 = arith.constant 64 : index
    %c0_1 = arith.constant 0 : index
    %1 = vector.load %arg0[%c64, %c0_1] : memref<272x128xf32, #tpu.memory_space<vmem>>, vector<128x128xf32>
    %c192 = arith.constant 192 : index
    %c0_2 = arith.constant 0 : index
    %2 = vector.load %arg0[%c192, %c0_2] : memref<272x128xf32, #tpu.memory_space<vmem>>, vector<32x128xf32>
    %c224 = arith.constant 224 : index
    %c0_3 = arith.constant 0 : index
    %3 = vector.load %arg0[%c224, %c0_3] : memref<272x128xf32, #tpu.memory_space<vmem>>, vector<1x128xf32>
    %c232 = arith.constant 232 : index
    %c0_4 = arith.constant 0 : index
    %4 = vector.load %arg0[%c232, %c0_4] : memref<272x128xf32, #tpu.memory_space<vmem>>, vector<32x128xf32>
    %c264 = arith.constant 264 : index
    %c0_5 = arith.constant 0 : index
    %5 = vector.load %arg0[%c264, %c0_5] : memref<272x128xf32, #tpu.memory_space<vmem>>, vector<1x128xf32>
    %cst = arith.constant dense<0.000000e+00> : vector<64x128xf32>
    %6 = tpu.matmul %0, %1, %cst {dimension_numbers = #tpu.dot_dimension_numbers<[1], [0], [0], [1], [0, 0, 1, 1], [], []>} : vector<64x128xf32>, vector<128x128xf32>, vector<64x128xf32> -> vector<64x128xf32>
    %7 = vector.broadcast %3 : vector<1x128xf32> to vector<64x128xf32>
    %8 = arith.addf %6, %7 : vector<64x128xf32>
    %cst_6 = arith.constant 0.000000e+00 : f32
    %9 = vector.broadcast %cst_6 : f32 to vector<8x32xf32>
    %cst_7 = arith.constant 0.000000e+00 : f32
    %10 = vector.broadcast %cst_7 : f32 to vector<8x32xf32>
    %11 = vector.extract_strided_slice %8 {offsets = [0, 0], sizes = [8, 128], strides = [1, 1]} : vector<64x128xf32> to vector<8x128xf32>
    %cst_8 = arith.constant dense<0.000000e+00> : vector<8x128xf32>
    %12 = tpu.matmul %9, %2, %cst_8 {dimension_numbers = #tpu.dot_dimension_numbers<[1], [0], [0], [1], [0, 0, 1, 1], [], []>} : vector<8x32xf32>, vector<32x128xf32>, vector<8x128xf32> -> vector<8x128xf32>
    %13 = arith.addf %11, %12 : vector<8x128xf32>
    %14 = arith.negf %13 : vector<8x128xf32>
    %15 = math.exp %14 : vector<8x128xf32>
    %cst_9 = arith.constant 1.000000e+00 : f32
    %16 = vector.broadcast %cst_9 : f32 to vector<8x128xf32>
    %17 = arith.addf %16, %15 : vector<8x128xf32>
    %18 = arith.divf %16, %17 : vector<8x128xf32>
    %19 = vector.extract_strided_slice %18 {offsets = [0, 0], sizes = [8, 32], strides = [1, 1]} : vector<8x128xf32> to vector<8x32xf32>
    %20 = vector.extract_strided_slice %18 {offsets = [0, 32], sizes = [8, 32], strides = [1, 1]} : vector<8x128xf32> to vector<8x32xf32>
    %21 = vector.extract_strided_slice %18 {offsets = [0, 64], sizes = [8, 32], strides = [1, 1]} : vector<8x128xf32> to vector<8x32xf32>
    %cst_10 = arith.constant 2.000000e+00 : f32
    %22 = vector.broadcast %cst_10 : f32 to vector<8x32xf32>
    %23 = arith.mulf %22, %21 : vector<8x32xf32>
    %cst_11 = arith.constant 1.000000e+00 : f32
    %24 = vector.broadcast %cst_11 : f32 to vector<8x32xf32>
    %25 = arith.subf %23, %24 : vector<8x32xf32>
    %26 = vector.extract_strided_slice %18 {offsets = [0, 96], sizes = [8, 32], strides = [1, 1]} : vector<8x128xf32> to vector<8x32xf32>
    %27 = arith.mulf %20, %10 : vector<8x32xf32>
    %28 = arith.mulf %19, %25 : vector<8x32xf32>
    %29 = arith.addf %27, %28 : vector<8x32xf32>
    %30 = math.tanh %29 : vector<8x32xf32>
    %31 = arith.mulf %26, %30 : vector<8x32xf32>
    %32 = vector.extract_strided_slice %8 {offsets = [8, 0], sizes = [8, 128], strides = [1, 1]} : vector<64x128xf32> to vector<8x128xf32>
    %cst_12 = arith.constant dense<0.000000e+00> : vector<8x128xf32>
    %33 = tpu.matmul %31, %2, %cst_12 {dimension_numbers = #tpu.dot_dimension_numbers<[1], [0], [0], [1], [0, 0, 1, 1], [], []>} : vector<8x32xf32>, vector<32x128xf32>, vector<8x128xf32> -> vector<8x128xf32>
    %34 = arith.addf %32, %33 : vector<8x128xf32>
    %35 = arith.negf %34 : vector<8x128xf32>
    %36 = math.exp %35 : vector<8x128xf32>
    %cst_13 = arith.constant 1.000000e+00 : f32
    %37 = vector.broadcast %cst_13 : f32 to vector<8x128xf32>
    %38 = arith.addf %37, %36 : vector<8x128xf32>
    %39 = arith.divf %37, %38 : vector<8x128xf32>
    %40 = vector.extract_strided_slice %39 {offsets = [0, 0], sizes = [8, 32], strides = [1, 1]} : vector<8x128xf32> to vector<8x32xf32>
    %41 = vector.extract_strided_slice %39 {offsets = [0, 32], sizes = [8, 32], strides = [1, 1]} : vector<8x128xf32> to vector<8x32xf32>
    %42 = vector.extract_strided_slice %39 {offsets = [0, 64], sizes = [8, 32], strides = [1, 1]} : vector<8x128xf32> to vector<8x32xf32>
    %cst_14 = arith.constant 2.000000e+00 : f32
    %43 = vector.broadcast %cst_14 : f32 to vector<8x32xf32>
    %44 = arith.mulf %43, %42 : vector<8x32xf32>
    %cst_15 = arith.constant 1.000000e+00 : f32
    %45 = vector.broadcast %cst_15 : f32 to vector<8x32xf32>
    %46 = arith.subf %44, %45 : vector<8x32xf32>
    %47 = vector.extract_strided_slice %39 {offsets = [0, 96], sizes = [8, 32], strides = [1, 1]} : vector<8x128xf32> to vector<8x32xf32>
    %48 = arith.mulf %41, %29 : vector<8x32xf32>
    %49 = arith.mulf %40, %46 : vector<8x32xf32>
    %50 = arith.addf %48, %49 : vector<8x32xf32>
    %51 = math.tanh %50 : vector<8x32xf32>
    %52 = arith.mulf %47, %51 : vector<8x32xf32>
    %53 = vector.extract_strided_slice %8 {offsets = [16, 0], sizes = [8, 128], strides = [1, 1]} : vector<64x128xf32> to vector<8x128xf32>
    %cst_16 = arith.constant dense<0.000000e+00> : vector<8x128xf32>
    %54 = tpu.matmul %52, %2, %cst_16 {dimension_numbers = #tpu.dot_dimension_numbers<[1], [0], [0], [1], [0, 0, 1, 1], [], []>} : vector<8x32xf32>, vector<32x128xf32>, vector<8x128xf32> -> vector<8x128xf32>
    %55 = arith.addf %53, %54 : vector<8x128xf32>
    %56 = arith.negf %55 : vector<8x128xf32>
    %57 = math.exp %56 : vector<8x128xf32>
    %cst_17 = arith.constant 1.000000e+00 : f32
    %58 = vector.broadcast %cst_17 : f32 to vector<8x128xf32>
    %59 = arith.addf %58, %57 : vector<8x128xf32>
    %60 = arith.divf %58, %59 : vector<8x128xf32>
    %61 = vector.extract_strided_slice %60 {offsets = [0, 0], sizes = [8, 32], strides = [1, 1]} : vector<8x128xf32> to vector<8x32xf32>
    %62 = vector.extract_strided_slice %60 {offsets = [0, 32], sizes = [8, 32], strides = [1, 1]} : vector<8x128xf32> to vector<8x32xf32>
    %63 = vector.extract_strided_slice %60 {offsets = [0, 64], sizes = [8, 32], strides = [1, 1]} : vector<8x128xf32> to vector<8x32xf32>
    %cst_18 = arith.constant 2.000000e+00 : f32
    %64 = vector.broadcast %cst_18 : f32 to vector<8x32xf32>
    %65 = arith.mulf %64, %63 : vector<8x32xf32>
    %cst_19 = arith.constant 1.000000e+00 : f32
    %66 = vector.broadcast %cst_19 : f32 to vector<8x32xf32>
    %67 = arith.subf %65, %66 : vector<8x32xf32>
    %68 = vector.extract_strided_slice %60 {offsets = [0, 96], sizes = [8, 32], strides = [1, 1]} : vector<8x128xf32> to vector<8x32xf32>
    %69 = arith.mulf %62, %50 : vector<8x32xf32>
    %70 = arith.mulf %61, %67 : vector<8x32xf32>
    %71 = arith.addf %69, %70 : vector<8x32xf32>
    %72 = math.tanh %71 : vector<8x32xf32>
    %73 = arith.mulf %68, %72 : vector<8x32xf32>
    %74 = vector.extract_strided_slice %8 {offsets = [24, 0], sizes = [8, 128], strides = [1, 1]} : vector<64x128xf32> to vector<8x128xf32>
    %cst_20 = arith.constant dense<0.000000e+00> : vector<8x128xf32>
    %75 = tpu.matmul %73, %2, %cst_20 {dimension_numbers = #tpu.dot_dimension_numbers<[1], [0], [0], [1], [0, 0, 1, 1], [], []>} : vector<8x32xf32>, vector<32x128xf32>, vector<8x128xf32> -> vector<8x128xf32>
    %76 = arith.addf %74, %75 : vector<8x128xf32>
    %77 = arith.negf %76 : vector<8x128xf32>
    %78 = math.exp %77 : vector<8x128xf32>
    %cst_21 = arith.constant 1.000000e+00 : f32
    %79 = vector.broadcast %cst_21 : f32 to vector<8x128xf32>
    %80 = arith.addf %79, %78 : vector<8x128xf32>
    %81 = arith.divf %79, %80 : vector<8x128xf32>
    %82 = vector.extract_strided_slice %81 {offsets = [0, 0], sizes = [8, 32], strides = [1, 1]} : vector<8x128xf32> to vector<8x32xf32>
    %83 = vector.extract_strided_slice %81 {offsets = [0, 32], sizes = [8, 32], strides = [1, 1]} : vector<8x128xf32> to vector<8x32xf32>
    %84 = vector.extract_strided_slice %81 {offsets = [0, 64], sizes = [8, 32], strides = [1, 1]} : vector<8x128xf32> to vector<8x32xf32>
    %cst_22 = arith.constant 2.000000e+00 : f32
    %85 = vector.broadcast %cst_22 : f32 to vector<8x32xf32>
    %86 = arith.mulf %85, %84 : vector<8x32xf32>
    %cst_23 = arith.constant 1.000000e+00 : f32
    %87 = vector.broadcast %cst_23 : f32 to vector<8x32xf32>
    %88 = arith.subf %86, %87 : vector<8x32xf32>
    %89 = vector.extract_strided_slice %81 {offsets = [0, 96], sizes = [8, 32], strides = [1, 1]} : vector<8x128xf32> to vector<8x32xf32>
    %90 = arith.mulf %83, %71 : vector<8x32xf32>
    %91 = arith.mulf %82, %88 : vector<8x32xf32>
    %92 = arith.addf %90, %91 : vector<8x32xf32>
    %93 = math.tanh %92 : vector<8x32xf32>
    %94 = arith.mulf %89, %93 : vector<8x32xf32>
    %95 = vector.extract_strided_slice %8 {offsets = [32, 0], sizes = [8, 128], strides = [1, 1]} : vector<64x128xf32> to vector<8x128xf32>
    %cst_24 = arith.constant dense<0.000000e+00> : vector<8x128xf32>
    %96 = tpu.matmul %94, %2, %cst_24 {dimension_numbers = #tpu.dot_dimension_numbers<[1], [0], [0], [1], [0, 0, 1, 1], [], []>} : vector<8x32xf32>, vector<32x128xf32>, vector<8x128xf32> -> vector<8x128xf32>
    %97 = arith.addf %95, %96 : vector<8x128xf32>
    %98 = arith.negf %97 : vector<8x128xf32>
    %99 = math.exp %98 : vector<8x128xf32>
    %cst_25 = arith.constant 1.000000e+00 : f32
    %100 = vector.broadcast %cst_25 : f32 to vector<8x128xf32>
    %101 = arith.addf %100, %99 : vector<8x128xf32>
    %102 = arith.divf %100, %101 : vector<8x128xf32>
    %103 = vector.extract_strided_slice %102 {offsets = [0, 0], sizes = [8, 32], strides = [1, 1]} : vector<8x128xf32> to vector<8x32xf32>
    %104 = vector.extract_strided_slice %102 {offsets = [0, 32], sizes = [8, 32], strides = [1, 1]} : vector<8x128xf32> to vector<8x32xf32>
    %105 = vector.extract_strided_slice %102 {offsets = [0, 64], sizes = [8, 32], strides = [1, 1]} : vector<8x128xf32> to vector<8x32xf32>
    %cst_26 = arith.constant 2.000000e+00 : f32
    %106 = vector.broadcast %cst_26 : f32 to vector<8x32xf32>
    %107 = arith.mulf %106, %105 : vector<8x32xf32>
    %cst_27 = arith.constant 1.000000e+00 : f32
    %108 = vector.broadcast %cst_27 : f32 to vector<8x32xf32>
    %109 = arith.subf %107, %108 : vector<8x32xf32>
    %110 = vector.extract_strided_slice %102 {offsets = [0, 96], sizes = [8, 32], strides = [1, 1]} : vector<8x128xf32> to vector<8x32xf32>
    %111 = arith.mulf %104, %92 : vector<8x32xf32>
    %112 = arith.mulf %103, %109 : vector<8x32xf32>
    %113 = arith.addf %111, %112 : vector<8x32xf32>
    %114 = math.tanh %113 : vector<8x32xf32>
    %115 = arith.mulf %110, %114 : vector<8x32xf32>
    %116 = vector.extract_strided_slice %8 {offsets = [40, 0], sizes = [8, 128], strides = [1, 1]} : vector<64x128xf32> to vector<8x128xf32>
    %cst_28 = arith.constant dense<0.000000e+00> : vector<8x128xf32>
    %117 = tpu.matmul %115, %2, %cst_28 {dimension_numbers = #tpu.dot_dimension_numbers<[1], [0], [0], [1], [0, 0, 1, 1], [], []>} : vector<8x32xf32>, vector<32x128xf32>, vector<8x128xf32> -> vector<8x128xf32>
    %118 = arith.addf %116, %117 : vector<8x128xf32>
    %119 = arith.negf %118 : vector<8x128xf32>
    %120 = math.exp %119 : vector<8x128xf32>
    %cst_29 = arith.constant 1.000000e+00 : f32
    %121 = vector.broadcast %cst_29 : f32 to vector<8x128xf32>
    %122 = arith.addf %121, %120 : vector<8x128xf32>
    %123 = arith.divf %121, %122 : vector<8x128xf32>
    %124 = vector.extract_strided_slice %123 {offsets = [0, 0], sizes = [8, 32], strides = [1, 1]} : vector<8x128xf32> to vector<8x32xf32>
    %125 = vector.extract_strided_slice %123 {offsets = [0, 32], sizes = [8, 32], strides = [1, 1]} : vector<8x128xf32> to vector<8x32xf32>
    %126 = vector.extract_strided_slice %123 {offsets = [0, 64], sizes = [8, 32], strides = [1, 1]} : vector<8x128xf32> to vector<8x32xf32>
    %cst_30 = arith.constant 2.000000e+00 : f32
    %127 = vector.broadcast %cst_30 : f32 to vector<8x32xf32>
    %128 = arith.mulf %127, %126 : vector<8x32xf32>
    %cst_31 = arith.constant 1.000000e+00 : f32
    %129 = vector.broadcast %cst_31 : f32 to vector<8x32xf32>
    %130 = arith.subf %128, %129 : vector<8x32xf32>
    %131 = vector.extract_strided_slice %123 {offsets = [0, 96], sizes = [8, 32], strides = [1, 1]} : vector<8x128xf32> to vector<8x32xf32>
    %132 = arith.mulf %125, %113 : vector<8x32xf32>
    %133 = arith.mulf %124, %130 : vector<8x32xf32>
    %134 = arith.addf %132, %133 : vector<8x32xf32>
    %135 = math.tanh %134 : vector<8x32xf32>
    %136 = arith.mulf %131, %135 : vector<8x32xf32>
    %137 = vector.extract_strided_slice %8 {offsets = [48, 0], sizes = [8, 128], strides = [1, 1]} : vector<64x128xf32> to vector<8x128xf32>
    %cst_32 = arith.constant dense<0.000000e+00> : vector<8x128xf32>
    %138 = tpu.matmul %136, %2, %cst_32 {dimension_numbers = #tpu.dot_dimension_numbers<[1], [0], [0], [1], [0, 0, 1, 1], [], []>} : vector<8x32xf32>, vector<32x128xf32>, vector<8x128xf32> -> vector<8x128xf32>
    %139 = arith.addf %137, %138 : vector<8x128xf32>
    %140 = arith.negf %139 : vector<8x128xf32>
    %141 = math.exp %140 : vector<8x128xf32>
    %cst_33 = arith.constant 1.000000e+00 : f32
    %142 = vector.broadcast %cst_33 : f32 to vector<8x128xf32>
    %143 = arith.addf %142, %141 : vector<8x128xf32>
    %144 = arith.divf %142, %143 : vector<8x128xf32>
    %145 = vector.extract_strided_slice %144 {offsets = [0, 0], sizes = [8, 32], strides = [1, 1]} : vector<8x128xf32> to vector<8x32xf32>
    %146 = vector.extract_strided_slice %144 {offsets = [0, 32], sizes = [8, 32], strides = [1, 1]} : vector<8x128xf32> to vector<8x32xf32>
    %147 = vector.extract_strided_slice %144 {offsets = [0, 64], sizes = [8, 32], strides = [1, 1]} : vector<8x128xf32> to vector<8x32xf32>
    %cst_34 = arith.constant 2.000000e+00 : f32
    %148 = vector.broadcast %cst_34 : f32 to vector<8x32xf32>
    %149 = arith.mulf %148, %147 : vector<8x32xf32>
    %cst_35 = arith.constant 1.000000e+00 : f32
    %150 = vector.broadcast %cst_35 : f32 to vector<8x32xf32>
    %151 = arith.subf %149, %150 : vector<8x32xf32>
    %152 = vector.extract_strided_slice %144 {offsets = [0, 96], sizes = [8, 32], strides = [1, 1]} : vector<8x128xf32> to vector<8x32xf32>
    %153 = arith.mulf %146, %134 : vector<8x32xf32>
    %154 = arith.mulf %145, %151 : vector<8x32xf32>
    %155 = arith.addf %153, %154 : vector<8x32xf32>
    %156 = math.tanh %155 : vector<8x32xf32>
    %157 = arith.mulf %152, %156 : vector<8x32xf32>
    %158 = vector.extract_strided_slice %8 {offsets = [56, 0], sizes = [8, 128], strides = [1, 1]} : vector<64x128xf32> to vector<8x128xf32>
    %cst_36 = arith.constant dense<0.000000e+00> : vector<8x128xf32>
    %159 = tpu.matmul %157, %2, %cst_36 {dimension_numbers = #tpu.dot_dimension_numbers<[1], [0], [0], [1], [0, 0, 1, 1], [], []>} : vector<8x32xf32>, vector<32x128xf32>, vector<8x128xf32> -> vector<8x128xf32>
    %160 = arith.addf %158, %159 : vector<8x128xf32>
    %161 = arith.negf %160 : vector<8x128xf32>
    %162 = math.exp %161 : vector<8x128xf32>
    %cst_37 = arith.constant 1.000000e+00 : f32
    %163 = vector.broadcast %cst_37 : f32 to vector<8x128xf32>
    %164 = arith.addf %163, %162 : vector<8x128xf32>
    %165 = arith.divf %163, %164 : vector<8x128xf32>
    %166 = vector.extract_strided_slice %165 {offsets = [0, 0], sizes = [8, 32], strides = [1, 1]} : vector<8x128xf32> to vector<8x32xf32>
    %167 = vector.extract_strided_slice %165 {offsets = [0, 32], sizes = [8, 32], strides = [1, 1]} : vector<8x128xf32> to vector<8x32xf32>
    %168 = vector.extract_strided_slice %165 {offsets = [0, 64], sizes = [8, 32], strides = [1, 1]} : vector<8x128xf32> to vector<8x32xf32>
    %cst_38 = arith.constant 2.000000e+00 : f32
    %169 = vector.broadcast %cst_38 : f32 to vector<8x32xf32>
    %170 = arith.mulf %169, %168 : vector<8x32xf32>
    %cst_39 = arith.constant 1.000000e+00 : f32
    %171 = vector.broadcast %cst_39 : f32 to vector<8x32xf32>
    %172 = arith.subf %170, %171 : vector<8x32xf32>
    %173 = vector.extract_strided_slice %165 {offsets = [0, 96], sizes = [8, 32], strides = [1, 1]} : vector<8x128xf32> to vector<8x32xf32>
    %174 = arith.mulf %167, %155 : vector<8x32xf32>
    %175 = arith.mulf %166, %172 : vector<8x32xf32>
    %176 = arith.addf %174, %175 : vector<8x32xf32>
    %177 = math.tanh %176 : vector<8x32xf32>
    %178 = arith.mulf %173, %177 : vector<8x32xf32>
    %cst_40 = arith.constant dense<0.000000e+00> : vector<8x128xf32>
    %179 = tpu.matmul %178, %4, %cst_40 {dimension_numbers = #tpu.dot_dimension_numbers<[1], [0], [0], [1], [0, 0, 1, 1], [], []>} : vector<8x32xf32>, vector<32x128xf32>, vector<8x128xf32> -> vector<8x128xf32>
    %180 = vector.broadcast %5 : vector<1x128xf32> to vector<8x128xf32>
    %181 = arith.addf %179, %180 : vector<8x128xf32>
    %c0_41 = arith.constant 0 : index
    %c0_42 = arith.constant 0 : index
    %182 = vector.load %arg1[%c0_41, %c0_42] : memref<8x128xf32, #tpu.memory_space<vmem>>, vector<8x128xf32>
    tpu.vector_store %arg1[%c0_41, %c0_42], %181 {strides = array<i32>} : memref<8x128xf32, #tpu.memory_space<vmem>>, vector<8x128xf32>,
    return
  }
}

</mosaic_0001>

<bundles_post_ra>
// kernel: tiny_lstm_forward.1
= control target key start
LH: loop header
LB: loop body
LE: loop exit
PB: predicated region body
PF: predicated region fallthrough
CT: control target
= control target key end

     0   :  { %v703_v12 = vmov 0.0   ;;  %s704_s21 = smov 64   ;;  %s705_s22 = smov 32   ;;  %vm84_vm4 = vcmask 261120   ;;  %s911_s0 = inlined_call_operand.vmem [shape: f32[272,128], index: 0, kind: input, shape index: {}]   ;;  %s912_s1 = inlined_call_operand.vmem [shape: f32[8,128], index: 1, kind: output, shape index: {}]  }
   0x1   :  { %v31_v0 = vld [vmem:[%s911_s0 + $0xb8] sm:$0xff]  ;;  %v30_v1 = vld [vmem:[%s911_s0 + $0xb0] sm:$0xff]  ;;  %v29_v2 = vld [vmem:[%s911_s0 + $0xa8] sm:$0xff] }
   0x2   :  { %43 = vmatpush.msra.mxu0 %v31_v0  ;;  %v28_v3 = vld [vmem:[%s911_s0 + $0xa0] sm:$0xff]  ;;  %v731_v4 = vld [vmem:[%s911_s0 + $0xd8] sm:$0xff]  ;;  %v737_v5 = vld [vmem:[%s911_s0 + $0xd0] sm:$0xff] }
   0x3   :  { %100 = vmatpush.msra.mxu1 %v731_v4  ;;  %v27_v6 = vld [vmem:[%s911_s0 + $0x98] sm:$0xff]  ;;  %v745_v7 = vld [vmem:[%s911_s0 + $0xc8] sm:$0xff]  ;;  %164 = vmatpush.msra.mxu2 %v731_v4  ;;  %v26_v8 = vld [vmem:[%s911_s0 + $0x90] sm:$0xff] }
   0x4   :  { %44 = vmatpush.msra.mxu0 %v30_v1  ;;  %228 = vmatpush.msra.mxu3 %v731_v4  ;;  %v756_v9 = vld [vmem:[%s911_s0 + $0xc0] sm:$0xff]  ;;  %v25_v10 = vld [vmem:[%s911_s0 + $0x88] sm:$0xff]  ;;  %v23_v13 = vld [vmem:[%s911_s0 + $0x78] sm:$0xff] }
   0x5   :  { %101 = vmatpush.msra.mxu1 %v737_v5  ;;  %165 = vmatpush.msra.mxu2 %v737_v5  ;;  %v24_v11 = vld [vmem:[%s911_s0 + $0x80] sm:$0xff]  ;;  %v22_v14 = vld [vmem:[%s911_s0 + $0x70] sm:$0xff]  ;;  %v21_v15 = vld [vmem:[%s911_s0 + $0x68] sm:$0xff] }
   0x6   :  { %45 = vmatpush.msra.mxu0 %v29_v2  ;;  %229 = vmatpush.msra.mxu3 %v737_v5  ;;  %v20_v16 = vld [vmem:[%s911_s0 + $0x60] sm:$0xff]  ;;  %v19_v17 = vld [vmem:[%s911_s0 + $0x58] sm:$0xff]  ;;  %v18_v18 = vld [vmem:[%s911_s0 + $0x50] sm:$0xff] }
   0x7   :  { %102 = vmatpush.msra.mxu1 %v745_v7  ;;  %166 = vmatpush.msra.mxu2 %v745_v7  ;;  %v17_v19 = vld [vmem:[%s911_s0 + $0x48] sm:$0xff]  ;;  %v16_v20 = vld [vmem:[%s911_s0 + $0x40] sm:$0xff] }
   0x8   :  { %46 = vmatpush.msra.mxu0 %v28_v3  ;;  %230 = vmatpush.msra.mxu3 %v745_v7  ;;  %v8_v21 = vld [vmem:[%s911_s0] sm:$0xff]  ;;  %v9_v50 = vld [vmem:[%s911_s0 + $0x8] sm:$0xff] }
   0x9   :  { %103 = vmatpush.msra.mxu1 %v756_v9  ;;  %167 = vmatpush.msra.mxu2 %v756_v9  ;;  %v818_v22 = vld [vmem:[%s911_s0 + $0xe0] ss:$0 sm:$0xff] }
   0xa   :  { %47 = vmatpush.msra.mxu0 %v27_v6  ;;  %104 = vmatmul.f32.vlgmr.msra.gmra.mxu1 %v703_v12 }
   0xb   :  { %231 = vmatpush.msra.mxu3 %v756_v9  ;;  %292 = vmatpush.msrb.mxu1 %v731_v4 }
   0xc   :  { %48 = vmatpush.msra.mxu0 %v26_v8  ;;  %356 = vmatpush.msrb.mxu2 %v731_v4 }
   0xd   :  { %420 = vmatpush.msrb.mxu3 %v731_v4  ;;  %293 = vmatpush.msrb.mxu1 %v737_v5 }
   0xe   :  { %49 = vmatpush.msra.mxu0 %v25_v10  ;;  %357 = vmatpush.msrb.mxu2 %v737_v5 }
   0xf   :  { %421 = vmatpush.msrb.mxu3 %v737_v5  ;;  %294 = vmatpush.msrb.mxu1 %v745_v7 }
  0x10   :  { %50 = vmatpush.msra.mxu0 %v24_v11  ;;  %358 = vmatpush.msrb.mxu2 %v745_v7 }
  0x11   :  { %422 = vmatpush.msrb.mxu3 %v745_v7  ;;  %295 = vmatpush.msrb.mxu1 %v756_v9 }
  0x12   :  { %51 = vmatpush.msra.mxu0 %v23_v13  ;;  %359 = vmatpush.msrb.mxu2 %v756_v9 }
  0x13   :  { %423 = vmatpush.msrb.mxu3 %v756_v9  ;;  %484 = vmatpush.msra.mxu1 %v731_v4 }
  0x14   :  { %52 = vmatpush.msra.mxu0 %v22_v14 }
  0x15   :  { %485 = vmatpush.msra.mxu1 %v737_v5 }
  0x16   :  { %53 = vmatpush.msra.mxu0 %v21_v15  ;;  %v10_v15 = vld [vmem:[%s911_s0 + $0x10] sm:$0xff] }
  0x17   :  { %486 = vmatpush.msra.mxu1 %v745_v7 }
  0x18   :  { %54 = vmatpush.msra.mxu0 %v20_v16 }
  0x19   :  { %487 = vmatpush.msra.mxu1 %v756_v9 }
  0x1a   :  { %55 = vmatpush.msra.mxu0 %v19_v17 }
  0x1c   :  { %56 = vmatpush.msra.mxu0 %v18_v18 }
  0x1e   :  { %57 = vmatpush.msra.mxu0 %v17_v19 }
  0x20   :  { %58 = vmatpush.msra.mxu0 %v16_v20 }
  0x21   :  { %59 = vmatmul.f32.vlgmr.msra.gmra.mxu0 %v8_v21 }
  0x29   :  { %62 = vmatmul.f32.gmra.mxu0 %v9_v50 }
  0x31   :  { %65 = vmatmul.f32.gmra.mxu0 %v10_v15 }
  0x87   :  { %v105_v24 = vpop.f32.mrf.mxu1 }
  0x9e   :  { %v60_v23 = vpop.f32.mrf.mxu0 }
  0x9f   :  { %v61_v25 = vadd.f32 %v818_v22, %v60_v23 }
  0xa1   :  { %v108_v26 = vadd.f32 %v105_v24, %v61_v25 }
  0xa3   :  { %v626_v27 = vmul.f32 -1.442695, %v108_v26 }
  0xa5   :  { %655 = vpow2.f32 %v626_v27 }
  0xa6   :  { %v63_v52 = vpop.f32.mrf.mxu0 }
  0xa7   :  { %v64_v53 = vadd.f32 %v818_v22, %v63_v52 }
  0xab   :  { %v656_v28 = vpop.eup %655 }
  0xac   :  { %v112_v29 = vadd.f32 1.0, %v656_v28 }
  0xae   :  { %657 = vrcp.f32 %v112_v29  ;;  %v124_v33 = vand.u32 2147483648, %v112_v29  ;;  %v122_v35 = vand.u32 2147483647, %v112_v29  ;;  %vm118_vm1 = vweird.f32 %v112_v29  ;;  %v66_v17 = vpop.f32.mrf.mxu0 }
  0xaf   :  { %v67_v18 = vadd.f32 %v818_v22, %v66_v17 }
  0xb0   :  { %v125_v37 = vor.u32 1.1754944e-38, %v124_v33  ;;  %vm123_vm3 = vcmp.eq.f32.partialorder %v122_v35, 8.507059e+37 }
  0xb4   :  { %v658_v30 = vpop.eup %657 }
  0xb5   :  { %v114_v31 = vmul.f32 %v658_v30, %v112_v29  ;;  %vm119_vm0 = vweird.f32 %v658_v30 }
  0xb6   :  { %vm120_vm2 = vmor %vm118_vm1, %vm119_vm0 }
  0xb7   :  { %v115_v32 = vsub.f32 1.0, %v114_v31 }
  0xb9   :  { %v116_v34 = vmul.f32 %v658_v30, %v115_v32 }
  0xbb   :  { %v117_v36 = vadd.f32 %v658_v30, %v116_v34 }
  0xbd   :  { %v121_v38 = vsel %vm120_vm2, %v658_v30, %v117_v36 }
  0xbe   :  { %v126_v39 = vsel %vm123_vm3, %v125_v37, %v121_v38 }
  0xbf   :  { %v128_v40 = vmul.f32 2.0, %v126_v39  ;;  %v130_v44 = vmul.f32 0.0, %v126_v39 }
  0xc1   :  { %v627_v41 = vadd.f32 -1.0, %v128_v40 }
  0xc3   :  { %132 = vrot.lane.b32.xlu0 %v627_v41, %s704_s21 }
 0x135   :  { %v133_v42 = vpop.permute.xlu0 %132 }
 0x136   :  { %v135_v43 = vmul.f32 %v133_v42, %v126_v39 }
 0x138   :  { %137 = vrot.lane.b32.xlu0 %v135_v43, %s705_s22  ;;  %v11_v43 = vld [vmem:[%s911_s0 + $0x18] sm:$0xff] }
 0x139   :  { %68 = vmatmul.f32.gmra.mxu0 %v11_v43 }
 0x1aa   :  { %v138_v45 = vpop.permute.xlu0 %137 }
 0x1ab   :  { %v140_v46 = vadd.f32 %v138_v45, %v130_v44 }
 0x1ad   :  { %659 = vtanh.f32 %v140_v46 }
 0x1b3   :  { %v660_v47 = vpop.eup %659 }
 0x1b4   :  { %143 = vrot.lane.b32.xlu1 %v660_v47, %s704_s21 }
 0x1b6   :  { %v69_v47 = vpop.f32.mrf.mxu0 }
 0x226   :  { %v144_v48 = vpop.permute.xlu1 %143 }
 0x227   :  { %v146_v49 = vmul.f32 %v144_v48, %v126_v39  ;;  %v70_v48 = vadd.f32 %v818_v22, %v69_v47 }
 0x229   :  { %148 = vrot.lane.b32.xlu1 %v146_v49, %s705_s22 }
 0x29b   :  { %v149_v51 = vpop.permute.xlu1 %148 }
 0x29c   :  { %628 = vmatmul.msk.f32.vlgmr.msra.gmra.mxu2 %vm84_vm4, %v149_v51 }
 0x29d   :  { %548 = vmatpush.msra.mxu2 %v731_v4 }
 0x29f   :  { %549 = vmatpush.msra.mxu2 %v737_v5 }
 0x2a1   :  { %550 = vmatpush.msra.mxu2 %v745_v7 }
 0x2a3   :  { %551 = vmatpush.msra.mxu2 %v756_v9 }
 0x31f   :  { %v169_v54 = vpop.f32.mrf.mxu2 }
 0x320   :  { %v172_v55 = vadd.f32 %v169_v54, %v64_v53 }
 0x322   :  { %v629_v56 = vmul.f32 -1.442695, %v172_v55 }
 0x324   :  { %661 = vpow2.f32 %v629_v56 }
 0x32a   :  { %v662_v57 = vpop.eup %661 }
 0x32b   :  { %v176_v58 = vadd.f32 1.0, %v662_v57 }
 0x32d   :  { %663 = vrcp.f32 %v176_v58  ;;  %v188_v62 = vand.u32 2147483648, %v176_v58  ;;  %v186_v0 = vand.u32 2147483647, %v176_v58  ;;  %vm182_vm6 = vweird.f32 %v176_v58 }
 0x32f   :  { %v189_v2 = vor.u32 1.1754944e-38, %v188_v62  ;;  %vm187_vm8 = vcmp.eq.f32.partialorder %v186_v0, 8.507059e+37 }
 0x333   :  { %v664_v59 = vpop.eup %663 }
 0x334   :  { %v178_v60 = vmul.f32 %v664_v59, %v176_v58  ;;  %vm183_vm5 = vweird.f32 %v664_v59 }
 0x335   :  { %vm184_vm7 = vmor %vm182_vm6, %vm183_vm5 }
 0x336   :  { %v179_v61 = vsub.f32 1.0, %v178_v60 }
 0x338   :  { %v180_v63 = vmul.f32 %v664_v59, %v179_v61 }
 0x33a   :  { %v181_v1 = vadd.f32 %v664_v59, %v180_v63 }
 0x33c   :  { %v185_v3 = vsel %vm184_vm7, %v664_v59, %v181_v1 }
 0x33d   :  { %v190_v4 = vsel %vm187_vm8, %v189_v2, %v185_v3 }
 0x33e   :  { %v192_v5 = vmul.f32 2.0, %v190_v4  ;;  %v194_v9 = vmul.f32 %v190_v4, %v140_v46 }
 0x340   :  { %v630_v6 = vadd.f32 -1.0, %v192_v5 }
 0x342   :  { %196 = vrot.lane.b32.xlu2 %v630_v6, %s704_s21 }
 0x39c   :  { %v197_v7 = vpop.permute.xlu2 %196 }
 0x39d   :  { %v199_v8 = vmul.f32 %v197_v7, %v190_v4 }
 0x39f   :  { %201 = vrot.lane.b32.xlu2 %v199_v8, %s705_s22 }
 0x3f9   :  { %v202_v10 = vpop.permute.xlu2 %201 }
 0x3fa   :  { %v204_v11 = vadd.f32 %v202_v10, %v194_v9  ;;  %v12_v10 = vld [vmem:[%s911_s0 + $0x20] sm:$0xff] }
 0x3fb   :  { %71 = vmatmul.f32.gmra.mxu0 %v12_v10 }
 0x3fc   :  { %665 = vtanh.f32 %v204_v11 }
 0x402   :  { %v666_v12 = vpop.eup %665 }
 0x403   :  { %207 = vrot.lane.b32.xlu0 %v666_v12, %s704_s21 }
 0x475   :  { %v208_v13 = vpop.permute.xlu0 %207 }
 0x476   :  { %v210_v14 = vmul.f32 %v208_v13, %v190_v4 }
 0x478   :  { %212 = vrot.lane.b32.xlu1 %v210_v14, %s705_s22  ;;  %v72_v12 = vpop.f32.mrf.mxu0 }
 0x479   :  { %v73_v13 = vadd.f32 %v818_v22, %v72_v12 }
 0x4ea   :  { %v213_v16 = vpop.permute.xlu1 %212 }
 0x4eb   :  { %631 = vmatmul.msk.f32.vlgmr.msra.gmra.mxu3 %vm84_vm4, %v213_v16 }
 0x56e   :  { %v233_v19 = vpop.f32.mrf.mxu3 }
 0x56f   :  { %v236_v20 = vadd.f32 %v233_v19, %v67_v18 }
 0x571   :  { %v632_v21 = vmul.f32 -1.442695, %v236_v20 }
 0x573   :  { %667 = vpow2.f32 %v632_v21 }
 0x579   :  { %v668_v23 = vpop.eup %667 }
 0x57a   :  { %v240_v24 = vadd.f32 1.0, %v668_v23 }
 0x57c   :  { %669 = vrcp.f32 %v240_v24  ;;  %v252_v28 = vand.u32 2147483648, %v240_v24  ;;  %v250_v30 = vand.u32 2147483647, %v240_v24  ;;  %vm246_vm10 = vweird.f32 %v240_v24 }
 0x57e   :  { %v253_v32 = vor.u32 1.1754944e-38, %v252_v28  ;;  %vm251_vm12 = vcmp.eq.f32.partialorder %v250_v30, 8.507059e+37 }
 0x582   :  { %v670_v25 = vpop.eup %669 }
 0x583   :  { %v242_v26 = vmul.f32 %v670_v25, %v240_v24  ;;  %vm247_vm9 = vweird.f32 %v670_v25 }
 0x584   :  { %vm248_vm11 = vmor %vm246_vm10, %vm247_vm9 }
 0x585   :  { %v243_v27 = vsub.f32 1.0, %v242_v26 }
 0x587   :  { %v244_v29 = vmul.f32 %v670_v25, %v243_v27 }
 0x589   :  { %v245_v31 = vadd.f32 %v670_v25, %v244_v29 }
 0x58b   :  { %v249_v33 = vsel %vm248_vm11, %v670_v25, %v245_v31 }
 0x58c   :  { %v254_v34 = vsel %vm251_vm12, %v253_v32, %v249_v33 }
 0x58d   :  { %v256_v35 = vmul.f32 2.0, %v254_v34  ;;  %v258_v39 = vmul.f32 %v254_v34, %v204_v11 }
 0x58f   :  { %v633_v36 = vadd.f32 -1.0, %v256_v35 }
 0x591   :  { %260 = vrot.lane.b32.xlu2 %v633_v36, %s704_s21 }
 0x5eb   :  { %v261_v37 = vpop.permute.xlu2 %260 }
 0x5ec   :  { %v263_v38 = vmul.f32 %v261_v37, %v254_v34 }
 0x5ee   :  { %265 = vrot.lane.b32.xlu0 %v263_v38, %s705_s22 }
 0x660   :  { %v266_v40 = vpop.permute.xlu0 %265 }
 0x661   :  { %v268_v41 = vadd.f32 %v266_v40, %v258_v39  ;;  %v13_v40 = vld [vmem:[%s911_s0 + $0x28] sm:$0xff] }
 0x662   :  { %74 = vmatmul.f32.gmra.mxu0 %v13_v40 }
 0x663   :  { %671 = vtanh.f32 %v268_v41 }
 0x669   :  { %v672_v42 = vpop.eup %671 }
 0x66a   :  { %271 = vrot.lane.b32.xlu1 %v672_v42, %s704_s21 }
 0x6dc   :  { %v272_v44 = vpop.permute.xlu1 %271 }
 0x6dd   :  { %v274_v45 = vmul.f32 %v272_v44, %v254_v34 }
 0x6df   :  { %276 = vrot.lane.b32.xlu2 %v274_v45, %s705_s22  ;;  %v75_v42 = vpop.f32.mrf.mxu0 }
 0x6e0   :  { %v76_v43 = vadd.f32 %v818_v22, %v75_v42 }
 0x739   :  { %v277_v46 = vpop.permute.xlu2 %276 }
 0x73a   :  { %634 = vmatmul.msk.f32.vlgmr.msrb.gmra.mxu1 %vm84_vm4, %v277_v46 }
 0x7b7   :  { %v297_v49 = vpop.f32.mrf.mxu1 }
 0x7b8   :  { %v300_v50 = vadd.f32 %v297_v49, %v70_v48 }
 0x7ba   :  { %v635_v51 = vmul.f32 -1.442695, %v300_v50 }
 0x7bc   :  { %673 = vpow2.f32 %v635_v51 }
 0x7c2   :  { %v674_v52 = vpop.eup %673 }
 0x7c3   :  { %v304_v53 = vadd.f32 1.0, %v674_v52 }
 0x7c5   :  { %675 = vrcp.f32 %v304_v53  ;;  %v316_v57 = vand.u32 2147483648, %v304_v53  ;;  %v314_v59 = vand.u32 2147483647, %v304_v53  ;;  %vm310_vm14 = vweird.f32 %v304_v53 }
 0x7c7   :  { %v317_v61 = vor.u32 1.1754944e-38, %v316_v57  ;;  %vm315_vm0 = vcmp.eq.f32.partialorder %v314_v59, 8.507059e+37 }
 0x7cb   :  { %v676_v54 = vpop.eup %675 }
 0x7cc   :  { %v306_v55 = vmul.f32 %v676_v54, %v304_v53  ;;  %vm311_vm13 = vweird.f32 %v676_v54 }
 0x7cd   :  { %vm312_vm15 = vmor %vm310_vm14, %vm311_vm13 }
 0x7ce   :  { %v307_v56 = vsub.f32 1.0, %v306_v55 }
 0x7d0   :  { %v308_v58 = vmul.f32 %v676_v54, %v307_v56 }
 0x7d2   :  { %v309_v60 = vadd.f32 %v676_v54, %v308_v58 }
 0x7d4   :  { %v313_v62 = vsel %vm312_vm15, %v676_v54, %v309_v60 }
 0x7d5   :  { %v318_v63 = vsel %vm315_vm0, %v317_v61, %v313_v62 }
 0x7d6   :  { %v320_v0 = vmul.f32 2.0, %v318_v63  ;;  %v322_v4 = vmul.f32 %v318_v63, %v268_v41 }
 0x7d8   :  { %v636_v1 = vadd.f32 -1.0, %v320_v0 }
 0x7da   :  { %324 = vrot.lane.b32.xlu0 %v636_v1, %s704_s21 }
 0x84c   :  { %v325_v2 = vpop.permute.xlu0 %324 }
 0x84d   :  { %v327_v3 = vmul.f32 %v325_v2, %v318_v63 }
 0x84f   :  { %329 = vrot.lane.b32.xlu1 %v327_v3, %s705_s22  ;;  %v14_v3 = vld [vmem:[%s911_s0 + $0x30] sm:$0xff] }
 0x850   :  { %77 = vmatmul.f32.gmra.mxu0 %v14_v3 }
 0x8c1   :  { %v330_v5 = vpop.permute.xlu1 %329 }
 0x8c2   :  { %v332_v6 = vadd.f32 %v330_v5, %v322_v4 }
 0x8c4   :  { %677 = vtanh.f32 %v332_v6 }
 0x8ca   :  { %v678_v7 = vpop.eup %677 }
 0x8cb   :  { %335 = vrot.lane.b32.xlu2 %v678_v7, %s704_s21 }
 0x8cd   :  { %v78_v7 = vpop.f32.mrf.mxu0 }
 0x925   :  { %v336_v8 = vpop.permute.xlu2 %335 }
 0x926   :  { %v338_v9 = vmul.f32 %v336_v8, %v318_v63  ;;  %v79_v8 = vadd.f32 %v818_v22, %v78_v7 }
 0x928   :  { %340 = vrot.lane.b32.xlu0 %v338_v9, %s705_s22 }
 0x99a   :  { %v341_v11 = vpop.permute.xlu0 %340 }
 0x99b   :  { %637 = vmatmul.msk.f32.vlgmr.msrb.gmra.mxu2 %vm84_vm4, %v341_v11 }
 0xa1e   :  { %v361_v14 = vpop.f32.mrf.mxu2 }
 0xa1f   :  { %v364_v15 = vadd.f32 %v361_v14, %v73_v13 }
 0xa21   :  { %v638_v16 = vmul.f32 -1.442695, %v364_v15 }
 0xa23   :  { %679 = vpow2.f32 %v638_v16 }
 0xa29   :  { %v680_v17 = vpop.eup %679 }
 0xa2a   :  { %v368_v18 = vadd.f32 1.0, %v680_v17 }
 0xa2c   :  { %681 = vrcp.f32 %v368_v18  ;;  %v380_v23 = vand.u32 2147483648, %v368_v18  ;;  %v378_v25 = vand.u32 2147483647, %v368_v18  ;;  %vm374_vm2 = vweird.f32 %v368_v18 }
 0xa2e   :  { %v381_v27 = vor.u32 1.1754944e-38, %v380_v23  ;;  %vm379_vm5 = vcmp.eq.f32.partialorder %v378_v25, 8.507059e+37 }
 0xa32   :  { %v682_v19 = vpop.eup %681 }
 0xa33   :  { %v370_v20 = vmul.f32 %v682_v19, %v368_v18  ;;  %vm375_vm1 = vweird.f32 %v682_v19 }
 0xa34   :  { %vm376_vm3 = vmor %vm374_vm2, %vm375_vm1 }
 0xa35   :  { %v371_v21 = vsub.f32 1.0, %v370_v20 }
 0xa37   :  { %v372_v24 = vmul.f32 %v682_v19, %v371_v21 }
 0xa39   :  { %v373_v26 = vadd.f32 %v682_v19, %v372_v24 }
 0xa3b   :  { %v377_v28 = vsel %vm376_vm3, %v682_v19, %v373_v26 }
 0xa3c   :  { %v382_v29 = vsel %vm379_vm5, %v381_v27, %v377_v28 }
 0xa3d   :  { %v384_v30 = vmul.f32 2.0, %v382_v29  ;;  %v386_v34 = vmul.f32 %v382_v29, %v332_v6 }
 0xa3f   :  { %v639_v31 = vadd.f32 -1.0, %v384_v30 }
 0xa41   :  { %388 = vrot.lane.b32.xlu1 %v639_v31, %s704_s21 }
 0xab3   :  { %v389_v32 = vpop.permute.xlu1 %388 }
 0xab4   :  { %v391_v33 = vmul.f32 %v389_v32, %v382_v29 }
 0xab6   :  { %393 = vrot.lane.b32.xlu2 %v391_v33, %s705_s22 }
 0xb10   :  { %v394_v35 = vpop.permute.xlu2 %393 }
 0xb11   :  { %v396_v36 = vadd.f32 %v394_v35, %v386_v34  ;;  %v15_v35 = vld [vmem:[%s911_s0 + $0x38] sm:$0xff] }
 0xb12   :  { %80 = vmatmul.f32.gmra.mxu0 %v15_v35 }
 0xb13   :  { %683 = vtanh.f32 %v396_v36 }
 0xb19   :  { %v684_v37 = vpop.eup %683 }
 0xb1a   :  { %399 = vrot.lane.b32.xlu0 %v684_v37, %s704_s21 }
 0xb8c   :  { %v400_v38 = vpop.permute.xlu0 %399 }
 0xb8d   :  { %v402_v39 = vmul.f32 %v400_v38, %v382_v29 }
 0xb8f   :  { %404 = vrot.lane.b32.xlu1 %v402_v39, %s705_s22  ;;  %v81_v37 = vpop.f32.mrf.mxu0 }
 0xb90   :  { %v82_v38 = vadd.f32 %v818_v22, %v81_v37 }
 0xc01   :  { %v405_v41 = vpop.permute.xlu1 %404 }
 0xc02   :  { %640 = vmatmul.msk.f32.vlgmr.msrb.gmra.mxu3 %vm84_vm4, %v405_v41 }
 0xc85   :  { %v425_v44 = vpop.f32.mrf.mxu3 }
 0xc86   :  { %v428_v45 = vadd.f32 %v425_v44, %v76_v43 }
 0xc88   :  { %v641_v46 = vmul.f32 -1.442695, %v428_v45 }
 0xc8a   :  { %685 = vpow2.f32 %v641_v46 }
 0xc90   :  { %v686_v47 = vpop.eup %685 }
 0xc91   :  { %v432_v48 = vadd.f32 1.0, %v686_v47 }
 0xc93   :  { %687 = vrcp.f32 %v432_v48  ;;  %v444_v52 = vand.u32 2147483648, %v432_v48  ;;  %v442_v54 = vand.u32 2147483647, %v432_v48  ;;  %vm438_vm7 = vweird.f32 %v432_v48 }
 0xc95   :  { %v445_v56 = vor.u32 1.1754944e-38, %v444_v52  ;;  %vm443_vm9 = vcmp.eq.f32.partialorder %v442_v54, 8.507059e+37 }
 0xc99   :  { %v688_v49 = vpop.eup %687 }
 0xc9a   :  { %v434_v50 = vmul.f32 %v688_v49, %v432_v48  ;;  %vm439_vm6 = vweird.f32 %v688_v49 }
 0xc9b   :  { %vm440_vm8 = vmor %vm438_vm7, %vm439_vm6 }
 0xc9c   :  { %v435_v51 = vsub.f32 1.0, %v434_v50 }
 0xc9e   :  { %v436_v53 = vmul.f32 %v688_v49, %v435_v51 }
 0xca0   :  { %v437_v55 = vadd.f32 %v688_v49, %v436_v53 }
 0xca2   :  { %v441_v57 = vsel %vm440_vm8, %v688_v49, %v437_v55 }
 0xca3   :  { %v446_v58 = vsel %vm443_vm9, %v445_v56, %v441_v57 }
 0xca4   :  { %v448_v59 = vmul.f32 2.0, %v446_v58  ;;  %v450_v63 = vmul.f32 %v446_v58, %v396_v36 }
 0xca6   :  { %v642_v60 = vadd.f32 -1.0, %v448_v59 }
 0xca8   :  { %452 = vrot.lane.b32.xlu2 %v642_v60, %s704_s21 }
 0xd02   :  { %v453_v61 = vpop.permute.xlu2 %452 }
 0xd03   :  { %v455_v62 = vmul.f32 %v453_v61, %v446_v58  ;;  %v40_v61 = vld [vmem:[%s911_s0 + $0x100] sm:$0xff] }
 0xd04   :  { %613 = vmatpush.msra.mxu3 %v40_v61 }
 0xd05   :  { %457 = vrot.lane.b32.xlu0 %v455_v62, %s705_s22  ;;  %v39_v62 = vld [vmem:[%s911_s0 + $0xf8] sm:$0xff] }
 0xd06   :  { %614 = vmatpush.msra.mxu3 %v39_v62 }
 0xd77   :  { %v458_v0 = vpop.permute.xlu0 %457 }
 0xd78   :  { %v460_v1 = vadd.f32 %v458_v0, %v450_v63  ;;  %v38_v63 = vld [vmem:[%s911_s0 + $0xf0] sm:$0xff]  ;;  %v37_v0 = vld [vmem:[%s911_s0 + $0xe8] sm:$0xff] }
 0xd79   :  { %615 = vmatpush.msra.mxu3 %v38_v63 }
 0xd7a   :  { %689 = vtanh.f32 %v460_v1 }
 0xd7b   :  { %616 = vmatpush.msra.mxu3 %v37_v0 }
 0xd80   :  { %v690_v2 = vpop.eup %689 }
 0xd81   :  { %463 = vrot.lane.b32.xlu1 %v690_v2, %s704_s21 }
 0xdf3   :  { %v464_v4 = vpop.permute.xlu1 %463 }
 0xdf4   :  { %v466_v5 = vmul.f32 %v464_v4, %v446_v58  ;;  %v654_v4 = vld [vmem:[%s911_s0 + $0x108] ss:$0 sm:$0xff] }
 0xdf6   :  { %468 = vrot.lane.b32.xlu2 %v466_v5, %s705_s22 }
 0xe50   :  { %v469_v6 = vpop.permute.xlu2 %468 }
 0xe51   :  { %643 = vmatmul.msk.f32.vlgmr.msra.gmra.mxu1 %vm84_vm4, %v469_v6 }
 0xece   :  { %v489_v9 = vpop.f32.mrf.mxu1 }
 0xecf   :  { %v492_v10 = vadd.f32 %v489_v9, %v79_v8 }
 0xed1   :  { %v644_v11 = vmul.f32 -1.442695, %v492_v10 }
 0xed3   :  { %691 = vpow2.f32 %v644_v11 }
 0xed9   :  { %v692_v12 = vpop.eup %691 }
 0xeda   :  { %v496_v13 = vadd.f32 1.0, %v692_v12 }
 0xedc   :  { %693 = vrcp.f32 %v496_v13  ;;  %v508_v17 = vand.u32 2147483648, %v496_v13  ;;  %v506_v19 = vand.u32 2147483647, %v496_v13  ;;  %vm502_vm11 = vweird.f32 %v496_v13 }
 0xede   :  { %v509_v21 = vor.u32 1.1754944e-38, %v508_v17  ;;  %vm507_vm13 = vcmp.eq.f32.partialorder %v506_v19, 8.507059e+37 }
 0xee2   :  { %v694_v14 = vpop.eup %693 }
 0xee3   :  { %v498_v15 = vmul.f32 %v694_v14, %v496_v13  ;;  %vm503_vm10 = vweird.f32 %v694_v14 }
 0xee4   :  { %vm504_vm12 = vmor %vm502_vm11, %vm503_vm10 }
 0xee5   :  { %v499_v16 = vsub.f32 1.0, %v498_v15 }
 0xee7   :  { %v500_v18 = vmul.f32 %v694_v14, %v499_v16 }
 0xee9   :  { %v501_v20 = vadd.f32 %v694_v14, %v500_v18 }
 0xeeb   :  { %v505_v23 = vsel %vm504_vm12, %v694_v14, %v501_v20 }
 0xeec   :  { %v510_v24 = vsel %vm507_vm13, %v509_v21, %v505_v23 }
 0xeed   :  { %v512_v25 = vmul.f32 2.0, %v510_v24  ;;  %v514_v29 = vmul.f32 %v510_v24, %v460_v1 }
 0xeef   :  { %v645_v26 = vadd.f32 -1.0, %v512_v25 }
 0xef1   :  { %516 = vrot.lane.b32.xlu0 %v645_v26, %s704_s21 }
 0xf63   :  { %v517_v27 = vpop.permute.xlu0 %516 }
 0xf64   :  { %v519_v28 = vmul.f32 %v517_v27, %v510_v24 }
 0xf66   :  { %521 = vrot.lane.b32.xlu1 %v519_v28, %s705_s22 }
 0xfd8   :  { %v522_v30 = vpop.permute.xlu1 %521 }
 0xfd9   :  { %v524_v31 = vadd.f32 %v522_v30, %v514_v29 }
 0xfdb   :  { %695 = vtanh.f32 %v524_v31 }
 0xfe1   :  { %v696_v32 = vpop.eup %695 }
 0xfe2   :  { %527 = vrot.lane.b32.xlu2 %v696_v32, %s704_s21 }
0x103c   :  { %v528_v33 = vpop.permute.xlu2 %527 }
0x103d   :  { %v530_v34 = vmul.f32 %v528_v33, %v510_v24 }
0x103f   :  { %532 = vrot.lane.b32.xlu0 %v530_v34, %s705_s22 }
0x10b1   :  { %v533_v36 = vpop.permute.xlu0 %532 }
0x10b2   :  { %646 = vmatmul.msk.f32.vlgmr.msra.gmra.mxu2 %vm84_vm4, %v533_v36 }
0x1135   :  { %v553_v39 = vpop.f32.mrf.mxu2 }
0x1136   :  { %v556_v40 = vadd.f32 %v553_v39, %v82_v38 }
0x1138   :  { %v647_v41 = vmul.f32 -1.442695, %v556_v40 }
0x113a   :  { %697 = vpow2.f32 %v647_v41 }
0x1140   :  { %v698_v42 = vpop.eup %697 }
0x1141   :  { %v560_v43 = vadd.f32 1.0, %v698_v42 }
0x1143   :  { %699 = vrcp.f32 %v560_v43  ;;  %v572_v47 = vand.u32 2147483648, %v560_v43  ;;  %v570_v49 = vand.u32 2147483647, %v560_v43  ;;  %vm566_vm15 = vweird.f32 %v560_v43 }
0x1145   :  { %v573_v51 = vor.u32 1.1754944e-38, %v572_v47  ;;  %vm571_vm1 = vcmp.eq.f32.partialorder %v570_v49, 8.507059e+37 }
0x1149   :  { %v700_v44 = vpop.eup %699 }
0x114a   :  { %v562_v45 = vmul.f32 %v700_v44, %v560_v43  ;;  %vm567_vm14 = vweird.f32 %v700_v44 }
0x114b   :  { %vm568_vm0 = vmor %vm566_vm15, %vm567_vm14 }
0x114c   :  { %v563_v46 = vsub.f32 1.0, %v562_v45 }
0x114e   :  { %v564_v48 = vmul.f32 %v700_v44, %v563_v46 }
0x1150   :  { %v565_v50 = vadd.f32 %v700_v44, %v564_v48 }
0x1152   :  { %v569_v52 = vsel %vm568_vm0, %v700_v44, %v565_v50 }
0x1153   :  { %v574_v22 = vsel %vm571_vm1, %v573_v51, %v569_v52 }
0x1154   :  { %v576_v53 = vmul.f32 2.0, %v574_v22  ;;  %v578_v57 = vmul.f32 %v574_v22, %v524_v31 }
0x1156   :  { %v648_v54 = vadd.f32 -1.0, %v576_v53 }
0x1158   :  { %580 = vrot.lane.b32.xlu1 %v648_v54, %s704_s21 }
0x11ca   :  { %v581_v55 = vpop.permute.xlu1 %580 }
0x11cb   :  { %v583_v56 = vmul.f32 %v581_v55, %v574_v22 }
0x11cd   :  { %585 = vrot.lane.b32.xlu2 %v583_v56, %s705_s22 }
0x1227   :  { %v586_v58 = vpop.permute.xlu2 %585 }
0x1228   :  { %v588_v59 = vadd.f32 %v586_v58, %v578_v57 }
0x122a   :  { %701 = vtanh.f32 %v588_v59 }
0x1230   :  { %v702_v60 = vpop.eup %701 }
0x1231   :  { %591 = vrot.lane.b32.xlu0 %v702_v60, %s704_s21 }
0x12a3   :  { %v592_v1 = vpop.permute.xlu0 %591 }
0x12a4   :  { %v594_v2 = vmul.f32 %v592_v1, %v574_v22 }
0x12a6   :  { %597 = vrot.lane.b32.xlu1 %v594_v2, %s705_s22 }
0x1318   :  { %v598_v3 = vpop.permute.xlu1 %597 }
0x1319   :  { %649 = vmatmul.msk.f32.vlgmr.msra.gmra.mxu3 %vm84_vm4, %v598_v3 }
0x139c   :  { %v618_v5 = vpop.f32.mrf.mxu3 }
0x139d   :  { %v619_v6 = vadd.f32 %v654_v4, %v618_v5 }
0x139f   :  { %621 = vst [vmem:[%s912_s1] sm:$0xff] %v619_v6 }

</bundles_post_ra>
